<compile_context>
chip_gen: v6e
topology: v6e:2x2x1
jax: 0.10.0
libtpu: 0.0.40
codegen_flags: <defaults>
</compile_context>

<pallas_src>
import numpy as np
import jax
import jax.numpy as jnp
from jax import lax
from jax.experimental import pallas as pl
from jax.experimental.pallas import tpu as pltpu

_EPS = 1e-5


def _tap_masks(H, W):
    """Per-tap 0/1 zero-padding masks for the 3x3 depthwise conv (trace-time)."""
    row = np.arange(H * W) // W
    col = np.arange(H * W) % W
    masks = np.empty((9, H * W), np.float32)
    for ky in range(3):
        for kx in range(3):
            dy, dx = ky - 1, kx - 1
            valid = np.ones(H * W, bool)
            if dy == -1:
                valid &= row >= 1
            elif dy == 1:
                valid &= row <= H - 2
            if dx == -1:
                valid &= col >= 1
            elif dx == 1:
                valid &= col <= W - 2
            masks[ky * 3 + kx] = valid.astype(np.float32)
    return jnp.asarray(masks)


def _pick_bblk(B, per_image_bytes, max_step_bytes=4 << 20, max_bblk=8):
    """Largest divisor of B (<= max_bblk) whose per-step working set fits the
    byte budget while keeping >= 2 grid steps (pipelining + v7x 2-TC sharding)."""
    best = 1
    for d in range(1, min(B, max_bblk) + 1):
        if B % d:
            continue
        if d * per_image_bytes > max_step_bytes:
            continue
        if B >= 2 and B // d < 2:
            continue
        best = d
    return best


def _make_kernel(H, W, cin, mid, bblk):
    """Fused channel_shuffle + stride-1 `layer` branch + concat for Bblk images.

    Input block  x_ref: (Bblk, cin, 2*HW)  (even channels in lanes [0,HW),
                                            odd channels in lanes [HW,2HW))
    Output block o_ref: (Bblk, cin+mid, HW) (passthrough channels, then branch).
    BN (inference) scales are pre-folded into the conv weights; only per-channel
    bias adds remain in the kernel.
    """
    HW = H * W

    def kernel(x_ref, w1_ref, b1_ref, wdw_ref, b2_ref, w2_ref, b3_ref,
               m_ref, o_ref):
        x = x_ref[...]                               # (Bblk, cin, 2*HW)

        # --- fused channel_shuffle + concat: even channels pass straight through
        o_ref[:, :cin, :] = x[:, :, :HW]

        w1 = w1_ref[...]                             # (mid, cin)  scale-folded
        w2 = w2_ref[...]                             # (mid, mid)  scale-folded
        wdw = wdw_ref[...]                           # (mid, 9) f32, scale-folded
        b1 = b1_ref[...]                             # (mid, 1) f32
        b2 = b2_ref[...]
        b3 = b3_ref[...]
        masks = m_ref[...]                           # (9, HW) f32 0/1

        # Hoist per-tap weight columns / masks out of the tap loop.
        w_taps = [wdw[:, k:k + 1] for k in range(9)]     # (mid, 1) each
        m_taps = [masks[k:k + 1, :] for k in range(9)]   # (1, HW) each

        for b in range(bblk):                        # unrolled, Bblk small
            xb = x[b, :, HW:]                        # odd channels, (cin, HW)

            # --- 1x1 conv (BN1 folded) + bias + ReLU; lane-dense MXU N = HW
            h = jnp.dot(w1, xb, preferred_element_type=jnp.float32)
            h = jnp.maximum(h + b1, 0.0)             # (mid, HW) f32

            # --- 3x3 depthwise conv, stride 1, pad 1 (BN2 folded), no ReLU.
            # Register-resident: taps via XLU lane rolls + precomputed 0/1
            # masks; 3 independent partial accumulators (one per kernel row).
            parts = []
            for ky in range(3):
                dy = ky - 1
                part = None
                for kx in range(3):
                    dx = kx - 1
                    k = ky * 3 + kx
                    if dy == 0 and dx == 0:
                        t = h * w_taps[k]
                    else:
                        shift = (-(dy * W + dx)) % HW
                        t = (pltpu.roll(h, shift, axis=1) * m_taps[k]) * w_taps[k]
                    part = t if part is None else part + t
                parts.append(part)
            acc = (parts[0] + parts[2]) + parts[1] + b2      # (mid, HW) f32

            # --- 1x1 conv (BN3 folded) + bias + ReLU
            y = jnp.dot(w2, acc.astype(w2.dtype),
                        preferred_element_type=jnp.float32)
            o_ref[b, cin:, :] = jnp.maximum(y + b3, 0.0).astype(o_ref.dtype)

    return kernel


def shuffle_block_stride1(x_nchw, params, *, compute_dtype=jnp.float32):
    """Forward pass of shuffleBlock with stride=1 (default construction)."""
    B, C, H, W = x_nchw.shape
    assert C % 4 == 0
    cin = C // 2
    mid = params["conv1_w"].shape[0]
    cout = cin + mid
    HW = H * W

    # Fold BatchNorm (inference) into per-channel scale/shift; fold scales into
    # the conv weights (zero runtime cost), keep only the biases.
    def fold_bn(g, b, m, v):
        s = g / jnp.sqrt(v + _EPS)
        return s, b - m * s

    s1, b1 = fold_bn(params["bn1_g"], params["bn1_b"], params["bn1_m"], params["bn1_v"])
    s2, b2 = fold_bn(params["bn2_g"], params["bn2_b"], params["bn2_m"], params["bn2_v"])
    s3, b3 = fold_bn(params["bn3_g"], params["bn3_b"], params["bn3_m"], params["bn3_v"])

    w1 = (params["conv1_w"][:, :, 0, 0] * s1[:, None]).astype(compute_dtype)   # (mid, cin)
    wdw = (params["dw_w"].reshape(mid, 9) * s2[:, None]).astype(jnp.float32)   # (mid, 9)
    w2 = (params["conv2_w"][:, :, 0, 0] * s3[:, None]).astype(compute_dtype)   # (mid, mid)
    colv = lambda v: v.reshape(-1, 1).astype(jnp.float32)                      # (mid, 1)

    masks = _tap_masks(H, W)                                                   # (9, HW)

    # Free contiguous reshape: lanes [0,HW) of row c2 = even channel 2*c2
    # (passthrough), lanes [HW,2HW) = odd channel 2*c2+1 (branch input).
    x_view = x_nchw.reshape(B, cin, 2 * HW).astype(compute_dtype)

    itemsize = np.dtype(compute_dtype).itemsize
    io_per_image = (cin * 2 * HW + cout * HW) * itemsize        # in + out block
    tmp_per_image = 6 * mid * HW * 4                            # f32 depthwise temporaries
    per_image_bytes = 2 * io_per_image + tmp_per_image          # ~double-buffered I/O
    bblk = _pick_bblk(B, per_image_bytes)
    grid = (B // bblk,)
    vmem_limit = int(min(max(bblk * per_image_bytes + (8 << 20), 32 << 20), 56 << 20))

    kernel = _make_kernel(H, W, cin, mid, bblk)
    grid_spec = pltpu.PrefetchScalarGridSpec(
        num_scalar_prefetch=0,
        grid=grid,
        in_specs=[
            pl.BlockSpec((bblk, cin, 2 * HW), lambda b: (b, 0, 0)),  # x (fused view)
            pl.BlockSpec((mid, cin), lambda b: (0, 0)),              # w1 (scale-folded)
            pl.BlockSpec((mid, 1), lambda b: (0, 0)),                # b1
            pl.BlockSpec((mid, 9), lambda b: (0, 0)),                # wdw (scale-folded)
            pl.BlockSpec((mid, 1), lambda b: (0, 0)),                # b2
            pl.BlockSpec((mid, mid), lambda b: (0, 0)),              # w2 (scale-folded)
            pl.BlockSpec((mid, 1), lambda b: (0, 0)),                # b3
            pl.BlockSpec((9, HW), lambda b: (0, 0)),                 # boundary masks
        ],
        out_specs=pl.BlockSpec((bblk, cout, HW), lambda b: (b, 0, 0)),
    )

    y = pl.pallas_call(
        kernel,
        out_shape=jax.ShapeDtypeStruct((B, cout, HW), compute_dtype),
        grid_spec=grid_spec,
        compiler_params=pltpu.CompilerParams(
            dimension_semantics=("parallel",),
            vmem_limit_bytes=vmem_limit,
        ),
    )(x_view, w1, colv(b1), wdw, colv(b2), w2, colv(b3), masks)

    return y.reshape(B, cout, H, W)                              # free reshape


# ----------------------- pure-JAX reference (for checking) -------------------
def ref_forward(x, params):
    mid = params["conv1_w"].shape[0]

    def bn(z, g, b, m, v):
        g = g[None, :, None, None]; b = b[None, :, None, None]
        m = m[None, :, None, None]; v = v[None, :, None, None]
        return (z - m) / jnp.sqrt(v + _EPS) * g + b

    x_proj = x[:, 0::2]
    xb = x[:, 1::2]
    dn = ("NCHW", "OIHW", "NCHW")
    h = lax.conv_general_dilated(xb, params["conv1_w"], (1, 1), "VALID",
                                 dimension_numbers=dn)
    h = jax.nn.relu(bn(h, params["bn1_g"], params["bn1_b"],
                       params["bn1_m"], params["bn1_v"]))
    h = lax.conv_general_dilated(h, params["dw_w"], (1, 1), ((1, 1), (1, 1)),
                                 dimension_numbers=dn, feature_group_count=mid)
    h = bn(h, params["bn2_g"], params["bn2_b"], params["bn2_m"], params["bn2_v"])
    h = lax.conv_general_dilated(h, params["conv2_w"], (1, 1), "VALID",
                                 dimension_numbers=dn)
    h = jax.nn.relu(bn(h, params["bn3_g"], params["bn3_b"],
                       params["bn3_m"], params["bn3_v"]))
    return jnp.concatenate([x_proj, h], axis=1)


# ----------------------- deterministic parameter init ------------------------
def init_params(key, in_channel, out_channel):
    mid = out_channel // 2
    ks = jax.random.split(key, 6)

    def bn_params(k):
        k1, k2, k3, k4 = jax.random.split(k, 4)
        g = jax.random.uniform(k1, (mid,), jnp.float32, 0.5, 1.5)
        b = 0.1 * jax.random.normal(k2, (mid,), jnp.float32)
        m = 0.1 * jax.random.normal(k3, (mid,), jnp.float32)
        v = jax.random.uniform(k4, (mid,), jnp.float32, 0.5, 1.5)
        return g, b, m, v

    p = {}
    p["conv1_w"] = 0.3 * jax.random.normal(ks[0], (mid, in_channel, 1, 1), jnp.float32)
    p["dw_w"]    = 0.3 * jax.random.normal(ks[1], (mid, 1, 3, 3), jnp.float32)
    p["conv2_w"] = 0.3 * jax.random.normal(ks[2], (mid, mid, 1, 1), jnp.float32)
    p["bn1_g"], p["bn1_b"], p["bn1_m"], p["bn1_v"] = bn_params(ks[3])
    p["bn2_g"], p["bn2_b"], p["bn2_m"], p["bn2_v"] = bn_params(ks[4])
    p["bn3_g"], p["bn3_b"], p["bn3_m"], p["bn3_v"] = bn_params(ks[5])
    return p


if __name__ == "__main__":
    key = jax.random.PRNGKey(0)
    kx, kp = jax.random.split(key)

    # Small shapes consistent with the stride=1 ShuffleNetV2 block:
    # input has C channels, the `layer` branch sees C//2 == in_channel channels,
    # out_channel == C so mid_channel == C//2.
    B, C, H, W = 2, 8, 16, 16
    in_channel, out_channel = C // 2, C

    x = jax.random.normal(kx, (B, C, H, W), jnp.float32)
    params = init_params(kp, in_channel, out_channel)

    y_ref = ref_forward(x, params)

    # f32 path: exact semantics of the PyTorch module.
    y = jax.block_until_ready(shuffle_block_stride1(x, params))
    assert y.shape == (B, C // 2 + out_channel // 2, H, W)
    err = float(jnp.max(jnp.abs(y - y_ref)))
    if not jnp.allclose(y, y_ref, rtol=1e-4, atol=1e-4):
        raise SystemExit(f"f32 mismatch vs reference: max abs err = {err}")

    # bf16 I/O + bf16 MXU path (halves HBM bytes; v6e/v7x bandwidth lever).
    # Depthwise elementwise math stays f32 inside the kernel (v5e VPU has no bf16).
    y16 = jax.block_until_ready(
        shuffle_block_stride1(x, params, compute_dtype=jnp.bfloat16))
    err16 = float(jnp.max(jnp.abs(y16.astype(jnp.float32) - y_ref)))
    if err16 > 0.2:
        raise SystemExit(f"bf16 mismatch vs reference: max abs err = {err16}")

    print("KERNEL_OK")
</pallas_src>

<mosaic_0001>
module attributes {stable_mosaic.version = 11 : i64} {
  func.func @kernel(%arg0: i32, %arg1: memref<1x4x512xf32, #tpu.memory_space<vmem>>, %arg2: memref<4x4xf32, #tpu.memory_space<vmem>>, %arg3: memref<4x1xf32, #tpu.memory_space<vmem>>, %arg4: memref<4x9xf32, #tpu.memory_space<vmem>>, %arg5: memref<4x1xf32, #tpu.memory_space<vmem>>, %arg6: memref<4x4xf32, #tpu.memory_space<vmem>>, %arg7: memref<4x1xf32, #tpu.memory_space<vmem>>, %arg8: memref<9x256xf32, #tpu.memory_space<vmem>>, %arg9: memref<1x8x256xf32, #tpu.memory_space<vmem>>) attributes {dimension_semantics = [#tpu.dimension_semantics<parallel>], iteration_bounds = array<i64: 2>, scalar_prefetch = 0 : i64, scratch_operands = 0 : i64, tpu.core_type = #tpu.core_type<tc>, window_params = [{transform_indices = @transform_0, window_bounds = array<i64: 1, 4, 512>}, {pipeline_mode = #tpu.pipeline_mode<synchronous>, transform_indices = @transform_1, window_bounds = array<i64: 4, 4>}, {pipeline_mode = #tpu.pipeline_mode<synchronous>, transform_indices = @transform_2, window_bounds = array<i64: 4, 1>}, {pipeline_mode = #tpu.pipeline_mode<synchronous>, transform_indices = @transform_3, window_bounds = array<i64: 4, 9>}, {pipeline_mode = #tpu.pipeline_mode<synchronous>, transform_indices = @transform_4, window_bounds = array<i64: 4, 1>}, {pipeline_mode = #tpu.pipeline_mode<synchronous>, transform_indices = @transform_5, window_bounds = array<i64: 4, 4>}, {pipeline_mode = #tpu.pipeline_mode<synchronous>, transform_indices = @transform_6, window_bounds = array<i64: 4, 1>}, {pipeline_mode = #tpu.pipeline_mode<synchronous>, transform_indices = @transform_7, window_bounds = array<i64: 9, 256>}, {transform_indices = @transform_8, window_bounds = array<i64: 1, 8, 256>}]} {
    %c0 = arith.constant 0 : index
    %c0_0 = arith.constant 0 : index
    %c0_1 = arith.constant 0 : index
    %0 = vector.load %arg1[%c0, %c0_0, %c0_1] : memref<1x4x512xf32, #tpu.memory_space<vmem>>, vector<1x4x512xf32>
    %1 = vector.extract_strided_slice %0 {offsets = [0, 0, 0], sizes = [1, 4, 256], strides = [1, 1, 1]} : vector<1x4x512xf32> to vector<1x4x256xf32>
    %c0_2 = arith.constant 0 : index
    %c0_3 = arith.constant 0 : index
    %c0_4 = arith.constant 0 : index
    %2 = vector.load %arg9[%c0_2, %c0_3, %c0_4] : memref<1x8x256xf32, #tpu.memory_space<vmem>>, vector<1x4x256xf32>
    tpu.vector_store %arg9[%c0_2, %c0_3, %c0_4], %1 {strides = array<i32>} : memref<1x8x256xf32, #tpu.memory_space<vmem>>, vector<1x4x256xf32>,
    %c0_5 = arith.constant 0 : index
    %c0_6 = arith.constant 0 : index
    %3 = vector.load %arg2[%c0_5, %c0_6] : memref<4x4xf32, #tpu.memory_space<vmem>>, vector<4x4xf32>
    %c0_7 = arith.constant 0 : index
    %c0_8 = arith.constant 0 : index
    %4 = vector.load %arg6[%c0_7, %c0_8] : memref<4x4xf32, #tpu.memory_space<vmem>>, vector<4x4xf32>
    %c0_9 = arith.constant 0 : index
    %c0_10 = arith.constant 0 : index
    %5 = vector.load %arg4[%c0_9, %c0_10] : memref<4x9xf32, #tpu.memory_space<vmem>>, vector<4x9xf32>
    %c0_11 = arith.constant 0 : index
    %c0_12 = arith.constant 0 : index
    %6 = vector.load %arg3[%c0_11, %c0_12] : memref<4x1xf32, #tpu.memory_space<vmem>>, vector<4x1xf32>
    %c0_13 = arith.constant 0 : index
    %c0_14 = arith.constant 0 : index
    %7 = vector.load %arg5[%c0_13, %c0_14] : memref<4x1xf32, #tpu.memory_space<vmem>>, vector<4x1xf32>
    %c0_15 = arith.constant 0 : index
    %c0_16 = arith.constant 0 : index
    %8 = vector.load %arg7[%c0_15, %c0_16] : memref<4x1xf32, #tpu.memory_space<vmem>>, vector<4x1xf32>
    %c0_17 = arith.constant 0 : index
    %c0_18 = arith.constant 0 : index
    %9 = vector.load %arg8[%c0_17, %c0_18] : memref<9x256xf32, #tpu.memory_space<vmem>>, vector<9x256xf32>
    %10 = vector.extract_strided_slice %5 {offsets = [0, 0], sizes = [4, 1], strides = [1, 1]} : vector<4x9xf32> to vector<4x1xf32>
    %11 = vector.extract_strided_slice %5 {offsets = [0, 1], sizes = [4, 1], strides = [1, 1]} : vector<4x9xf32> to vector<4x1xf32>
    %12 = vector.extract_strided_slice %5 {offsets = [0, 2], sizes = [4, 1], strides = [1, 1]} : vector<4x9xf32> to vector<4x1xf32>
    %13 = vector.extract_strided_slice %5 {offsets = [0, 3], sizes = [4, 1], strides = [1, 1]} : vector<4x9xf32> to vector<4x1xf32>
    %14 = vector.extract_strided_slice %5 {offsets = [0, 4], sizes = [4, 1], strides = [1, 1]} : vector<4x9xf32> to vector<4x1xf32>
    %15 = vector.extract_strided_slice %5 {offsets = [0, 5], sizes = [4, 1], strides = [1, 1]} : vector<4x9xf32> to vector<4x1xf32>
    %16 = vector.extract_strided_slice %5 {offsets = [0, 6], sizes = [4, 1], strides = [1, 1]} : vector<4x9xf32> to vector<4x1xf32>
    %17 = vector.extract_strided_slice %5 {offsets = [0, 7], sizes = [4, 1], strides = [1, 1]} : vector<4x9xf32> to vector<4x1xf32>
    %18 = vector.extract_strided_slice %5 {offsets = [0, 8], sizes = [4, 1], strides = [1, 1]} : vector<4x9xf32> to vector<4x1xf32>
    %19 = vector.extract_strided_slice %9 {offsets = [0, 0], sizes = [1, 256], strides = [1, 1]} : vector<9x256xf32> to vector<1x256xf32>
    %20 = vector.extract_strided_slice %9 {offsets = [1, 0], sizes = [1, 256], strides = [1, 1]} : vector<9x256xf32> to vector<1x256xf32>
    %21 = vector.extract_strided_slice %9 {offsets = [2, 0], sizes = [1, 256], strides = [1, 1]} : vector<9x256xf32> to vector<1x256xf32>
    %22 = vector.extract_strided_slice %9 {offsets = [3, 0], sizes = [1, 256], strides = [1, 1]} : vector<9x256xf32> to vector<1x256xf32>
    %23 = vector.extract_strided_slice %9 {offsets = [5, 0], sizes = [1, 256], strides = [1, 1]} : vector<9x256xf32> to vector<1x256xf32>
    %24 = vector.extract_strided_slice %9 {offsets = [6, 0], sizes = [1, 256], strides = [1, 1]} : vector<9x256xf32> to vector<1x256xf32>
    %25 = vector.extract_strided_slice %9 {offsets = [7, 0], sizes = [1, 256], strides = [1, 1]} : vector<9x256xf32> to vector<1x256xf32>
    %26 = vector.extract_strided_slice %9 {offsets = [8, 0], sizes = [1, 256], strides = [1, 1]} : vector<9x256xf32> to vector<1x256xf32>
    %27 = vector.extract_strided_slice %0 {offsets = [0, 0, 256], sizes = [1, 4, 256], strides = [1, 1, 1]} : vector<1x4x512xf32> to vector<1x4x256xf32>
    %28 = vector.shape_cast %27 : vector<1x4x256xf32> to vector<4x256xf32>
    %cst = arith.constant dense<0.000000e+00> : vector<4x256xf32>
    %29 = tpu.matmul %3, %28, %cst {dimension_numbers = #tpu.dot_dimension_numbers<[1], [0], [0], [1], [0, 0, 1, 1], [], []>} : vector<4x4xf32>, vector<4x256xf32>, vector<4x256xf32> -> vector<4x256xf32>
    %30 = vector.broadcast %6 : vector<4x1xf32> to vector<4x256xf32>
    %31 = arith.addf %29, %30 : vector<4x256xf32>
    %cst_19 = arith.constant 0.000000e+00 : f32
    %32 = vector.broadcast %cst_19 : f32 to vector<4x256xf32>
    %33 = arith.maximumf %31, %32 : vector<4x256xf32>
    %c17_i32 = arith.constant 17 : i32
    %34 = tpu.dynamic_rotate %33 by %c17_i32 dim 1 : vector<4x256xf32>, i32 -> vector<4x256xf32>
    %35 = vector.broadcast %19 : vector<1x256xf32> to vector<4x256xf32>
    %36 = arith.mulf %34, %35 : vector<4x256xf32>
    %37 = vector.broadcast %10 : vector<4x1xf32> to vector<4x256xf32>
    %38 = arith.mulf %36, %37 : vector<4x256xf32>
    %c16_i32 = arith.constant 16 : i32
    %39 = tpu.dynamic_rotate %33 by %c16_i32 dim 1 : vector<4x256xf32>, i32 -> vector<4x256xf32>
    %40 = vector.broadcast %20 : vector<1x256xf32> to vector<4x256xf32>
    %41 = arith.mulf %39, %40 : vector<4x256xf32>
    %42 = vector.broadcast %11 : vector<4x1xf32> to vector<4x256xf32>
    %43 = arith.mulf %41, %42 : vector<4x256xf32>
    %44 = arith.addf %38, %43 : vector<4x256xf32>
    %c15_i32 = arith.constant 15 : i32
    %45 = tpu.dynamic_rotate %33 by %c15_i32 dim 1 : vector<4x256xf32>, i32 -> vector<4x256xf32>
    %46 = vector.broadcast %21 : vector<1x256xf32> to vector<4x256xf32>
    %47 = arith.mulf %45, %46 : vector<4x256xf32>
    %48 = vector.broadcast %12 : vector<4x1xf32> to vector<4x256xf32>
    %49 = arith.mulf %47, %48 : vector<4x256xf32>
    %50 = arith.addf %44, %49 : vector<4x256xf32>
    %c1_i32 = arith.constant 1 : i32
    %51 = tpu.dynamic_rotate %33 by %c1_i32 dim 1 : vector<4x256xf32>, i32 -> vector<4x256xf32>
    %52 = vector.broadcast %22 : vector<1x256xf32> to vector<4x256xf32>
    %53 = arith.mulf %51, %52 : vector<4x256xf32>
    %54 = vector.broadcast %13 : vector<4x1xf32> to vector<4x256xf32>
    %55 = arith.mulf %53, %54 : vector<4x256xf32>
    %56 = vector.broadcast %14 : vector<4x1xf32> to vector<4x256xf32>
    %57 = arith.mulf %33, %56 : vector<4x256xf32>
    %58 = arith.addf %55, %57 : vector<4x256xf32>
    %c255_i32 = arith.constant 255 : i32
    %59 = tpu.dynamic_rotate %33 by %c255_i32 dim 1 : vector<4x256xf32>, i32 -> vector<4x256xf32>
    %60 = vector.broadcast %23 : vector<1x256xf32> to vector<4x256xf32>
    %61 = arith.mulf %59, %60 : vector<4x256xf32>
    %62 = vector.broadcast %15 : vector<4x1xf32> to vector<4x256xf32>
    %63 = arith.mulf %61, %62 : vector<4x256xf32>
    %64 = arith.addf %58, %63 : vector<4x256xf32>
    %c241_i32 = arith.constant 241 : i32
    %65 = tpu.dynamic_rotate %33 by %c241_i32 dim 1 : vector<4x256xf32>, i32 -> vector<4x256xf32>
    %66 = vector.broadcast %24 : vector<1x256xf32> to vector<4x256xf32>
    %67 = arith.mulf %65, %66 : vector<4x256xf32>
    %68 = vector.broadcast %16 : vector<4x1xf32> to vector<4x256xf32>
    %69 = arith.mulf %67, %68 : vector<4x256xf32>
    %c240_i32 = arith.constant 240 : i32
    %70 = tpu.dynamic_rotate %33 by %c240_i32 dim 1 : vector<4x256xf32>, i32 -> vector<4x256xf32>
    %71 = vector.broadcast %25 : vector<1x256xf32> to vector<4x256xf32>
    %72 = arith.mulf %70, %71 : vector<4x256xf32>
    %73 = vector.broadcast %17 : vector<4x1xf32> to vector<4x256xf32>
    %74 = arith.mulf %72, %73 : vector<4x256xf32>
    %75 = arith.addf %69, %74 : vector<4x256xf32>
    %c239_i32 = arith.constant 239 : i32
    %76 = tpu.dynamic_rotate %33 by %c239_i32 dim 1 : vector<4x256xf32>, i32 -> vector<4x256xf32>
    %77 = vector.broadcast %26 : vector<1x256xf32> to vector<4x256xf32>
    %78 = arith.mulf %76, %77 : vector<4x256xf32>
    %79 = vector.broadcast %18 : vector<4x1xf32> to vector<4x256xf32>
    %80 = arith.mulf %78, %79 : vector<4x256xf32>
    %81 = arith.addf %75, %80 : vector<4x256xf32>
    %82 = arith.addf %50, %81 : vector<4x256xf32>
    %83 = arith.addf %82, %64 : vector<4x256xf32>
    %84 = vector.broadcast %7 : vector<4x1xf32> to vector<4x256xf32>
    %85 = arith.addf %83, %84 : vector<4x256xf32>
    %cst_20 = arith.constant dense<0.000000e+00> : vector<4x256xf32>
    %86 = tpu.matmul %4, %85, %cst_20 {dimension_numbers = #tpu.dot_dimension_numbers<[1], [0], [0], [1], [0, 0, 1, 1], [], []>} : vector<4x4xf32>, vector<4x256xf32>, vector<4x256xf32> -> vector<4x256xf32>
    %87 = vector.broadcast %8 : vector<4x1xf32> to vector<4x256xf32>
    %88 = arith.addf %86, %87 : vector<4x256xf32>
    %cst_21 = arith.constant 0.000000e+00 : f32
    %89 = vector.broadcast %cst_21 : f32 to vector<4x256xf32>
    %90 = arith.maximumf %88, %89 : vector<4x256xf32>
    %c0_22 = arith.constant 0 : index
    %c4 = arith.constant 4 : index
    %c0_23 = arith.constant 0 : index
    %91 = vector.load %arg9[%c0_22, %c4, %c0_23] : memref<1x8x256xf32, #tpu.memory_space<vmem>>, vector<1x4x256xf32>
    %92 = vector.shape_cast %91 : vector<1x4x256xf32> to vector<4x256xf32>
    %93 = vector.shape_cast %90 : vector<4x256xf32> to vector<1x4x256xf32>
    tpu.vector_store %arg9[%c0_22, %c4, %c0_23], %93 {strides = array<i32>} : memref<1x8x256xf32, #tpu.memory_space<vmem>>, vector<1x4x256xf32>,
    return
  }
  func.func @transform_0(%arg0: i32) -> (i32, i32, i32) {
    %c0_i32 = arith.constant 0 : i32
    %c0_i32_0 = arith.constant 0 : i32
    %c0_i32_1 = arith.constant 0 : i32
    return %arg0, %c0_i32, %c0_i32_0 : i32, i32, i32
  }
  func.func @transform_1(%arg0: i32) -> (i32, i32) {
    %c0_i32 = arith.constant 0 : i32
    %c0_i32_0 = arith.constant 0 : i32
    %c0_i32_1 = arith.constant 0 : i32
    return %c0_i32, %c0_i32_0 : i32, i32
  }
  func.func @transform_2(%arg0: i32) -> (i32, i32) {
    %c0_i32 = arith.constant 0 : i32
    %c0_i32_0 = arith.constant 0 : i32
    %c0_i32_1 = arith.constant 0 : i32
    return %c0_i32, %c0_i32_0 : i32, i32
  }
  func.func @transform_3(%arg0: i32) -> (i32, i32) {
    %c0_i32 = arith.constant 0 : i32
    %c0_i32_0 = arith.constant 0 : i32
    %c0_i32_1 = arith.constant 0 : i32
    return %c0_i32, %c0_i32_0 : i32, i32
  }
  func.func @transform_4(%arg0: i32) -> (i32, i32) {
    %c0_i32 = arith.constant 0 : i32
    %c0_i32_0 = arith.constant 0 : i32
    %c0_i32_1 = arith.constant 0 : i32
    return %c0_i32, %c0_i32_0 : i32, i32
  }
  func.func @transform_5(%arg0: i32) -> (i32, i32) {
    %c0_i32 = arith.constant 0 : i32
    %c0_i32_0 = arith.constant 0 : i32
    %c0_i32_1 = arith.constant 0 : i32
    return %c0_i32, %c0_i32_0 : i32, i32
  }
  func.func @transform_6(%arg0: i32) -> (i32, i32) {
    %c0_i32 = arith.constant 0 : i32
    %c0_i32_0 = arith.constant 0 : i32
    %c0_i32_1 = arith.constant 0 : i32
    return %c0_i32, %c0_i32_0 : i32, i32
  }
  func.func @transform_7(%arg0: i32) -> (i32, i32) {
    %c0_i32 = arith.constant 0 : i32
    %c0_i32_0 = arith.constant 0 : i32
    %c0_i32_1 = arith.constant 0 : i32
    return %c0_i32, %c0_i32_0 : i32, i32
  }
  func.func @transform_8(%arg0: i32) -> (i32, i32, i32) {
    %c0_i32 = arith.constant 0 : i32
    %c0_i32_0 = arith.constant 0 : i32
    %c0_i32_1 = arith.constant 0 : i32
    return %arg0, %c0_i32, %c0_i32_0 : i32, i32, i32
  }
}

</mosaic_0001>

<bundles_post_ra>
// kernel: tpu_custom_call.1
= control target key start
LH: loop header
LB: loop body
LE: loop exit
PB: predicated region body
PF: predicated region fallthrough
CT: control target
= control target key end

     0   :  { %s1432_s0 = inlined_call_operand.hbm [shape: f32[2,4,512], index: 0, kind: input, shape index: {}]   ;;  %s1433_s1 = inlined_call_operand.vmem [shape: f32[4,4], index: 1, kind: input, shape index: {}]   ;;  %s1434_s2 = inlined_call_operand.vmem [shape: f32[4,1], index: 2, kind: input, shape index: {}]   ;;  %s1435_s3 = inlined_call_operand.vmem [shape: f32[4,9], index: 3, kind: input, shape index: {}]   ;;  %s1436_s4 = inlined_call_operand.vmem [shape: f32[4,1], index: 4, kind: input, shape index: {}]   ;;  %s1437_s5 = inlined_call_operand.vmem [shape: f32[4,4], index: 5, kind: input, shape index: {}]   ;;  %s1438_s6 = inlined_call_operand.vmem [shape: f32[4,1], index: 6, kind: input, shape index: {}]   ;;  %s1439_s7 = inlined_call_operand.hbm [shape: f32[9,256], index: 7, kind: input, shape index: {}]   ;;  %s1440_s8 = inlined_call_operand.hbm [shape: f32[2,8,256], index: 8, kind: output, shape index: {}]  }
   0x1   :  { %1447 = sst [smem:[#allocation13_spill]] %s1439_s7 }
   0x2   :  { %13 = vsyncpa [#allocation3], 0 }
   0x3   :  { %15 = vsyncpa [#allocation3 + $0x1], 0 }
   0x4   :  { %16 = vsyncpa [#allocation6], 0 }
   0x5   :  { %17 = vsyncpa [#allocation4], 0 }
   0x6   :  { %19 = vsyncpa [#allocation4 + $0x1], 0  ;;  %s1157_s27 = smov 0   ;;  %s1159_s28 = smov 0  }
   0x7   :  { %s1161_s29 = smov 0   ;;  %s1163_s30 = smov 0  }
   0x8 LB: > { %s1178_s9 = sadd.s32 4294967295, %s1087_s30   ;;  %s849_s10 = sadd.s32 4294967294, %s1087_s30   ;;  %s1087_s30 = sphi %s1163_s30, %s1465_s30   ;;  %s1083_s29 = sphi %s1161_s29, %s1469_s29   ;;  %s1079_s28 = sphi %s1159_s28, %s1468_s28   ;;  %s1075_s27 = sphi %s1157_s27, %s1467_s27  }
   0x9   : > { %p45_p0 = scmp.ne.s32.totalorder %s1079_s28, %s1075_s27  ;;  %p1443_p1 = scmp.eq.s32.totalorder %s1178_s9, 0 }
   0xa   : > { %p222_p3 = scmp.eq.s32.totalorder %s849_s10, 1  ;;  %p850_p5 = scmp.ge.s32.totalorder %s1087_s30, 1 }
   0xb   : > { %p1187_p4 = por %p1443_p1, %p45_p0  ;;  %p229_p7 = scmp.lt.s32.totalorder %s1087_s30, 3 }
   0xc   : > { %p1192_p6 = por %p222_p3, %p45_p0  ;;  %s1089_s14 = smov [#allocation5]  }
   0xd   : > { %s1448_s11 = scalar_select %p1187_p4, 1, 0 }
   0xe   : > { %s1449_s12 = scalar_select %p1192_p6, 1, 0 }
   0xf   : > { %p1197_p8 = pnand %p850_p5, %p229_p7  ;;  %s259_s15 = sshll.u32 %s1089_s14, 4  ;;  %s260_s15 = int_to_ptr.vmem [resolvable:$true] %s259_s15 }
  0x10   : > { %s1211_s17 = sadd.s32 1, %s1087_s30   ;;  %s32_s18 = sadd.s32 1, %s1083_s29 }
  0x11   : > { %s1450_s13 = scalar_select %p1197_p8, 1, 0 }
  0x12   : > { %p883_p9 = pneg %p1197_p8  ;;  %1452 = sst [smem:[#allocation11_spill]] %s1211_s17 }
  0x13   : > { %s29_s19 = ssub.s32 %s1087_s30, %s1211_s17  ;;  %s976_s20 = scalar_lea.vmem %s260_s15, 512 }
  0x14   : > { %p1206_p11 = pnand %p883_p9, %p1443_p1  ;;  %p977_p13 = scmp.ne.s32.totalorder %s260_s15, %s976_s20 }
  0x15   : > { %p984_p5 = scmp.lt.s32.totalorder %s260_s15, %s260_s15  ;;  %p985_p7 = scmp.lt.s32.totalorder %s976_s20, %s976_s20 }
  0x16   : > { %p967_p12 = pneg %p1206_p11 }
  0x17   : > { %p986_p10 = por %p985_p7, %p984_p5 }
  0x18   : > { %p979_p0 = pnand %p977_p13, %p967_p12 }
  0x1a   : > { %p980_p3 = pneg %p979_p0 }
  0x1c   : > { %p987_p2 = pnand %p986_p10, %p980_p3 }
  0x1e   : > { %990 = shalt.err (!%p987_p2)
}
  0x1f   : > { %s1090_s21 = smov 256   ;;  %s1091_s22 = smov 16  }
  0x20   : > { %s1453_s7 = sld [smem:[#allocation13_spill]]  ;;  %p30_p9 = scmp.eq.s32.totalorder %s29_s19, 0 }
  0x21   : > { %p39_p12 = scmp.ne.s32.totalorder %s1083_s29, %s1079_s28  ;;  %p40_p10 = scmp.eq.s32.totalorder %s1087_s30, 0 }
  0x22   : > { %p896_p2 = scmp.lt.s32.totalorder %s1087_s30, 2  ;;  %p1455_p0 = scmp.eq.s32.totalorder %s1178_s9, 1 }
  0x23   : > { %s1228_s25 = scalar_select %p30_p9, %s1083_s29, %s32_s18  }
  0x24   : > { %p41_p13 = por %p40_p10, %p39_p12  ;;  %p1232_p3 = por %p1455_p0, %p39_p12 }
  0x25   : > { %1454 = sst [smem:[#allocation12_spill]] %s1228_s25  ;;  %s273_s10 = sand.u32 1, %s1083_s29  }
  0x26   : > { %886 = dma.hbm_to_vmem [thread:$0]  (!%p1206_p11), %s1453_s7, 512, %s260_s15, [#allocation6], %s1090_s21, %s1090_s21, %s1091_s22  }
  0x27   : > { %s1456_s26 = scalar_select %p1232_p3, 1, 0 }
  0x28   : > { %s873_s14 = sshll.u32 %s1087_s30, 8  ;;  %s853_s20 = sshll.u32 %s273_s10, 4 }
  0x29   : > { %s1241_s23 = scalar_lea.hbm %s1432_s0, %s873_s14  ;;  %s277_s15 = scalar_lea.vmem [#allocation2], %s853_s20 }
  0x2a   : > { %s285_s18 = sshll.u32 %s277_s15, 4  ;;  %p1243_p11 = pnand %p896_p2, %p41_p13  ;;  %s286_s18 = int_to_ptr.vmem [resolvable:$true] %s285_s18 }
  0x2b   : > { %s274_s21 = scalar_lea.sflag [#allocation3], %s273_s10  ;;  %s991_s22 = scalar_lea.hbm %s1241_s23, 256 }
  0x2c   : > { %p992_p5 = scmp.ne.s32.totalorder %s1241_s23, %s991_s22  ;;  %p993_p7 = pneg %p1243_p11 }
  0x2d   : > { %s996_s14 = scalar_lea.hbm %s1432_s0, 512  ;;  %p997_p10 = scmp.lt.s32.totalorder %s1241_s23, %s1432_s0 }
  0x2e   : > { %p994_p9 = pnand %p993_p7, %p992_p5  ;;  %p998_p2 = scmp.lt.s32.totalorder %s996_s14, %s991_s22 }
  0x30   : > { %p995_p12 = pneg %p994_p9  ;;  %p999_p13 = por %p998_p2, %p997_p10 }
  0x32   : > { %p1000_p0 = pnand %p999_p13, %p995_p12 }
  0x34   : > { %1003 = shalt.err (!%p1000_p0)
}
  0x35   : > { %s1004_s15 = scalar_lea.vmem %s286_s18, 256  ;;  %s1092_s10 = smov [#allocation2]  }
  0x36   : > { %p1005_p1 = scmp.ne.s32.totalorder %s286_s18, %s1004_s15  ;;  %s1009_s7 = sshll.u32 %s1092_s10, 4  ;;  %s1010_s7 = int_to_ptr.vmem [resolvable:$false] %s1009_s7 }
  0x37   : > { %s1011_s25 = scalar_lea.vmem %s1010_s7, 512  ;;  %p1012_p5 = scmp.lt.s32.totalorder %s286_s18, %s1010_s7 }
  0x38   : > { %p1007_p6 = pnand %p1005_p1, %p993_p7  ;;  %p1013_p9 = scmp.lt.s32.totalorder %s1011_s25, %s1004_s15 }
  0x3a   : > { %p1008_p3 = pneg %p1007_p6  ;;  %p1014_p4 = por %p1013_p9, %p1012_p5 }
  0x3c   : > { %p1015_p8 = pnand %p1014_p4, %p1008_p3 }
  0x3e   : > { %1018 = shalt.err (!%p1015_p8)
}
  0x3f   : > { %890 = dma.hbm_to_vmem [thread:$0]  (!%p1243_p11), %s1241_s23, 256, %s286_s18, %s274_s21  }
  0x40   : > { %p1458_p12 = scmp.ne.s32.totalorder %s1450_s13, 0 }
  0x41   : > { %s1264_s22 = sand.u32 (!%p1458_p12), 1, %s1079_s28   ;;  %p1459_p1 = scmp.ne.s32.totalorder (!%p1458_p12), %s1448_s11, 0 }
  0x42   : > { %294 = sbr.rel (%p1458_p12) target bundleno = 660 (0x294), region = 52  ;;  %s857_s17 = sshll.u32 (!%p1458_p12), %s1264_s22, 4 }
  0x43   : > { %s297_s7 = scalar_lea.sflag (!%p1458_p12), [#allocation3], %s1264_s22  ;;  %s1270_s25 = scalar_lea.vmem (!%p1458_p12), [#allocation2], %s857_s17 }
  0x47   : > { %1062 = dma.done.wait (%p1459_p1), %s297_s7, 256  }
  0x48   : > { %1064 = vsyncadd (%p1459_p1), %s297_s7, 4294967040  ;;  %p1460_p4 = scmp.eq.s32.totalorder %s1178_s9, 0 }
  0x4a   : > { %1066 = dma.done.wait (%p1460_p4), [#allocation6], 512   ;;  %p1461_p6 = pmov %p1460_p4 }
  0x4b   : > { %v1093_v0 = vmov 0.0   ;;  %v1094_v1 = vmov 1   ;;  %v1095_v2 = vmov 0   ;;  %v338_v3 = vld [vmem:[%s1270_s25 + $0x8] sm:$0xff]  ;;  %vm365_vm0 = vcmask 1043456   ;;  %s1103_s24 = smov 16  }
  0x4c   : > { %1068 = vsyncadd (%p1461_p6), [#allocation6], 4294966784  ;;  %434 = vmatprep.mubr.f32.mxu0 %v1093_v0  ;;  %953 = vset.pattern.permute.xlu1 %v1094_v1  ;;  %v346_v4 = vld [vmem:[%s1435_s3] sm:$0xf]  ;;  %v360_v5 = vcombine.high %v338_v3, %v338_v3  ;;  %vm361_vm1 = vcmask 31744   ;;  %v1096_v8 = vmov 6   ;;  %v447_v36 = vlaneseq }
  0x4d   : > { %952 = vset.pattern.permute.xlu0 %v1095_v2  ;;  %737 = vmatprep.mubr.f32.mxu1 %v1093_v0  ;;  %v347_v6 = vld [vmem:[%s1434_s2] sm:$0xf]  ;;  %v1097_v9 = vmov 7   ;;  %v1098_v10 = vmov 3   ;;  %v1099_v11 = vmov 2   ;;  %v1100_v12 = vmov 4  }
  0x4e   : > { %487 = vperm.xlu1 %953, %v346_v4   ;;  %v344_v7 = vld [vmem:[%s1433_s1] sm:$0xf]  ;;  %356 = vperm.xlu0 %952, %v347_v6   ;;  %v1101_v13 = vmov 8   ;;  %v1102_v14 = vmov 5   ;;  %s1104_s14 = smov 17   ;;  %s1105_s16 = smov 113  }
  0x4f   : > { %860 = vmatprep.subr.msk.mxu0 %vm365_vm0, %v360_v5  ;;  %s1106_s20 = smov 15   ;;  %s1107_s15 = smov 112   ;;  %v348_v22 = vld [vmem:[%s1436_s4] sm:$0xf]  ;;  %v1317_v39 = vshrl.u32 %v447_v36, 7  ;;  %v1319_v41 = vand.u32 127, %v447_v36 }
  0x50   : > { %861 = vmatpush1.msk.msra.mxu0 %vm365_vm0, %v338_v3  ;;  %s1108_s10 = smov 111   ;;  %s1109_s7 = smov 1   ;;  %v349_v23 = vld [vmem:[%s1438_s6] sm:$0xf]  ;;  %v351_v46 = vld [vmem:[#allocation5 + $0x8] sm:$0xff] }
  0x51   : > { %862 = vmatmul.mubr.msk.f32.vlgmr.msra.gmra.mxu0 %vm361_vm1, %v344_v7  ;;  %s1110_s13 = smov 127   ;;  %v454_v42 = vsub.s32 0, %v1317_v39  ;;  %v350_v44 = vld [vmem:[#allocation5] sm:$0xff]  ;;  %v478_v47 = vsub.s32 1, %v1317_v39  ;;  %v584_v48 = vsub.s32 6, %v1317_v39  ;;  %v607_v49 = vsub.s32 7, %v1317_v39 }
  0x52   : > { %954 = vset.pattern.permute.xlu1 %v1096_v8  ;;  %955 = vset.pattern.permute.xlu0 %v1097_v9  ;;  %vm449_vm2 = vcmp.lt.s32.totalorder %v1319_v41, 17  ;;  %v503_v51 = vsub.s32 2, %v1317_v39  ;;  %v528_v56 = vsub.s32 3, %v1317_v39  ;;  %vm473_vm3 = vcmp.lt.s32.totalorder %v1319_v41, 16  ;;  %p1462_p3 = scmp.ne.s32.totalorder %s1456_s26, 0 }
  0x53   : > { %593 = vperm.xlu1 %954, %v346_v4   ;;  %616 = vperm.xlu0 %955, %v346_v4   ;;  %v455_v50 = vrot.slane %v350_v44, %v454_v42  ;;  %v459_v54 = vrot.slane %v351_v46, %v454_v42  ;;  %v479_v57 = vrot.slane %v350_v44, %v478_v47  ;;  %vm602_vm4 = vcmp.lt.s32.totalorder %v1319_v41, 112 }
  0x54   : > { %v483_v58 = vrot.slane %v351_v46, %v478_v47  ;;  %vm579_vm5 = vcmp.lt.s32.totalorder %v1319_v41, 113  ;;  %v585_v60 = vrot.slane %v350_v44, %v584_v48  ;;  %v589_v61 = vrot.slane %v351_v46, %v584_v48  ;;  %v864_v47 = vld [vmem:[#allocation5 + $0x18] ss:$0 sm:$0xff] }
  0x55   : > { %v608_v62 = vrot.slane %v350_v44, %v607_v49  ;;  %v612_v63 = vrot.slane %v351_v46, %v607_v49  ;;  %vm498_vm6 = vcmp.lt.s32.totalorder %v1319_v41, 15  ;;  %v504_v0 = vrot.slane %v350_v44, %v503_v51 }
  0x56   : > { %v508_v1 = vrot.slane %v351_v46, %v503_v51  ;;  %vm523_vm7 = vcmp.lt.s32.totalorder %v1319_v41, 1  ;;  %v529_v5 = vrot.slane %v350_v44, %v528_v56  ;;  %v533_v8 = vrot.slane %v351_v46, %v528_v56 }
  0x57   : > { %957 = vset.pattern.permute.xlu1 %v1098_v10  ;;  %956 = vset.pattern.permute.xlu0 %v1099_v11  ;;  %vm627_vm8 = vcmp.lt.s32.totalorder %v1319_v41, 111  ;;  %vm554_vm9 = vcmp.lt.s32.totalorder %v1319_v41, 127  ;;  %v559_v11 = vsub.s32 5, %v1317_v39 }
  0x58   : > { %537 = vperm.xlu1 %957, %v346_v4   ;;  %512 = vperm.xlu0 %956, %v346_v4  }
  0x59   : > { %v564_v39 = vrot.slane %v351_v46, %v559_v11 }
  0x5c   : > { %958 = vset.pattern.permute.xlu1 %v1100_v12  ;;  %959 = vset.pattern.permute.xlu0 %v1101_v13 }
  0x5d   : > { %543 = vperm.xlu1 %958, %v346_v4   ;;  %641 = vperm.xlu0 %959, %v346_v4  }
  0x61   : > { %962 = vset.pattern.permute.xlu1 %v1095_v2  ;;  %960 = vset.pattern.permute.xlu0 %v1102_v14 }
  0x62   : > { %568 = vperm.xlu0 %960, %v346_v4  }
  0x66   : > { %961 = vset.pattern.permute.xlu0 %v1095_v2 }
  0x67   : > { %464 = vperm.xlu0 %961, %v346_v4  }
  0xc9   : > { %v357_v15 = vpop.permute.xlu0 %356  ;;  %v1299_v24 = vpop.permute.xlu1 %487 }
  0xce   : > { %v1301_v25 = vpop.permute.xlu1 %593  ;;  %v1303_v26 = vpop.permute.xlu0 %616 }
  0xd3   : > { %v1305_v27 = vpop.permute.xlu1 %537  ;;  %v1307_v28 = vpop.permute.xlu0 %512 }
  0xd8   : > { %v544_v29 = vpop.permute.xlu1 %543  ;;  %v1309_v30 = vpop.permute.xlu0 %641 }
  0xdd   : > { %v1311_v32 = vpop.permute.xlu0 %568 }
  0xe2   : > { %v1313_v34 = vpop.permute.xlu0 %464 }
 0x111   : > { %v436_v16 = vpop.f32.mrf.mxu0 }
 0x112   : > { %v437_v17 = vadd.f32 %v436_v16, %v357_v15 }
 0x113   : > { %v438_v19 = vpop.f32.mrf.mxu0 }
 0x114   : > { %v441_v18 = vmax.f32 %v437_v17, 0.0  ;;  %v439_v20 = vadd.f32 %v438_v19, %v357_v15 }
 0x116   : > { %469 = vrot.lane.b32.xlu0 %v441_v18, %s1103_s24  ;;  %443 = vrot.lane.b32.xlu1 %v441_v18, %s1104_s14  ;;  %v442_v21 = vmax.f32 %v439_v20, 0.0  ;;  %v1327_v52 = vmul.f32 %v544_v29, %v441_v18 }
 0x118   : > { %v1329_v53 = vmul.f32 %v544_v29, %v442_v21 }
 0x11a   : > { %575 = vrot.lane.b32.xlu0 %v441_v18, %s1105_s16  ;;  %494 = vrot.lane.b32.xlu1 %v441_v18, %s1106_s20 }
 0x11e   : > { %598 = vrot.lane.b32.xlu0 %v441_v18, %s1107_s15  ;;  %623 = vrot.lane.b32.xlu1 %v441_v18, %s1108_s10 }
 0x122   : > { %519 = vrot.lane.b32.xlu0 %v441_v18, %s1109_s7  ;;  %445 = vrot.lane.b32.xlu1 %v442_v21, %s1104_s14  ;;  %s336_s14 = scalar_lea.vmem [#allocation7], %s857_s17 }
 0x126   : > { %550 = vrot.lane.b32.xlu0 %v441_v18, %s1110_s13  ;;  %471 = vrot.lane.b32.xlu1 %v442_v21, %s1103_s24 }
 0x12a   : > { %654 = vperm.xlu0 %961, %v348_v22   ;;  %577 = vrot.lane.b32.xlu1 %v442_v21, %s1105_s16  ;;  %s874_s16 = sshll.u32 %s1178_s9, 8 }
 0x12b   : > { %s767_s17 = scalar_lea.hbm %s1440_s8, %s874_s16 }
 0x12e   : > { %600 = vrot.lane.b32.xlu1 %v442_v21, %s1107_s15 }
 0x132   : > { %496 = vrot.lane.b32.xlu1 %v442_v21, %s1106_s20  ;;  %s769_s20 = sshll.u32 %s336_s14, 4  ;;  %s770_s20 = int_to_ptr.vmem [resolvable:$true] %s769_s20 }
 0x136   : > { %521 = vrot.lane.b32.xlu1 %v442_v21, %s1109_s7  ;;  %s1019_s7 = scalar_lea.vmem %s770_s20, 256 }
 0x137   : > { %p1020_p8 = scmp.ne.s32.totalorder %s770_s20, %s1019_s7 }
 0x139   : > { %p1021_p11 = pnand %p1020_p8, %p1462_p3 }
 0x13a   : > { %625 = vrot.lane.b32.xlu1 %v442_v21, %s1108_s10  ;;  %s755_s10 = scalar_lea.sflag [#allocation4], %s1264_s22 }
 0x13b   : > { %p1022_p7 = pneg %p1021_p11 }
 0x13e   : > { %552 = vrot.lane.b32.xlu1 %v442_v21, %s1110_s13  ;;  %s1111_s13 = smov [#allocation7]  }
 0x13f   : > { %s1023_s23 = sshll.u32 %s1111_s13, 4  ;;  %s1024_s23 = int_to_ptr.vmem [resolvable:$false] %s1023_s23 }
 0x140   : > { %s1025_s9 = scalar_lea.vmem %s1024_s23, 512  ;;  %p1026_p10 = scmp.lt.s32.totalorder %s770_s20, %s1024_s23 }
 0x141   : > { %p1027_p2 = scmp.lt.s32.totalorder %s1025_s9, %s1019_s7 }
 0x142   : > { %661 = vperm.xlu1 %962, %v349_v23  }
 0x143   : > { %p1028_p13 = por %p1027_p2, %p1026_p10 }
 0x145   : > { %p1029_p0 = pnand %p1028_p13, %p1022_p7 }
 0x188   : > { %v444_v31 = vpop.permute.xlu1 %443  ;;  %v470_v38 = vpop.permute.xlu0 %469 }
 0x18c   : > { %v495_v33 = vpop.permute.xlu1 %494  ;;  %v576_v43 = vpop.permute.xlu0 %575 }
 0x190   : > { %v1315_v35 = vpop.permute.xlu1 %623  ;;  %v599_v59 = vpop.permute.xlu0 %598 }
 0x194   : > { %v446_v37 = vpop.permute.xlu1 %445  ;;  %v520_v16 = vpop.permute.xlu0 %519 }
 0x195   : > { %v450_v12 = vsel %vm449_vm2, %v444_v31, %v446_v37  ;;  %v451_v13 = vsel %vm449_vm2, %v446_v37, %v444_v31 }
 0x196   : > { %v460_v36 = vmul.f32 %v455_v50, %v451_v13  ;;  %v461_v37 = vmul.f32 %v459_v54, %v450_v12 }
 0x198   : > { %v472_v40 = vpop.permute.xlu1 %471  ;;  %v467_v54 = vmul.f32 %v1313_v34, %v460_v36 }
 0x199   : > { %v474_v6 = vsel %vm473_vm3, %v470_v38, %v472_v40  ;;  %v475_v7 = vsel %vm473_vm3, %v472_v40, %v470_v38  ;;  %v560_v38 = vrot.slane %v350_v44, %v559_v11 }
 0x19a   : > { %v484_v17 = vmul.f32 %v479_v57, %v475_v7  ;;  %v485_v18 = vmul.f32 %v483_v58, %v474_v6  ;;  %v468_v57 = vmul.f32 %v1313_v34, %v461_v37 }
 0x19c   : > { %v578_v45 = vpop.permute.xlu1 %577  ;;  %v490_v48 = vmul.f32 %v1299_v24, %v484_v17  ;;  %v491_v49 = vmul.f32 %v1299_v24, %v485_v18 }
 0x19d   : > { %v580_v9 = vsel %vm579_vm5, %v576_v43, %v578_v45  ;;  %v581_v10 = vsel %vm579_vm5, %v578_v45, %v576_v43 }
 0x19e   : > { %v590_v22 = vmul.f32 %v585_v60, %v580_v9  ;;  %v591_v23 = vmul.f32 %v589_v61, %v581_v10  ;;  %v493_v34 = vadd.f32 %v491_v49, %v468_v57 }
 0x1a0   : > { %v601_v55 = vpop.permute.xlu1 %600  ;;  %v596_v50 = vmul.f32 %v1301_v25, %v590_v22  ;;  %v597_v44 = vmul.f32 %v1301_v25, %v591_v23 }
 0x1a1   : > { %v603_v2 = vsel %vm602_vm4, %v599_v59, %v601_v55  ;;  %v604_v3 = vsel %vm602_vm4, %v601_v55, %v599_v59 }
 0x1a2   : > { %v613_v14 = vmul.f32 %v608_v62, %v603_v2  ;;  %v614_v15 = vmul.f32 %v612_v63, %v604_v3  ;;  %v551_v62 = vpop.permute.xlu0 %550  ;;  %v492_v3 = vadd.f32 %v490_v48, %v467_v54 }
 0x1a4   : > { %v497_v4 = vpop.permute.xlu1 %496  ;;  %v619_v40 = vmul.f32 %v1303_v26, %v613_v14  ;;  %v620_v42 = vmul.f32 %v1303_v26, %v614_v15 }
 0x1a5   : > { %v499_v19 = vsel %vm498_vm6, %v495_v33, %v497_v4  ;;  %v500_v20 = vsel %vm498_vm6, %v497_v4, %v495_v33  ;;  %v863_v33 = vld [vmem:[#allocation5 + $0x10] ss:$0 sm:$0xff] }
 0x1a6   : > { %v509_v43 = vmul.f32 %v504_v0, %v500_v20  ;;  %v510_v45 = vmul.f32 %v508_v1, %v499_v19  ;;  %v621_v59 = vadd.f32 %v619_v40, %v596_v50  ;;  %v622_v60 = vadd.f32 %v620_v42, %v597_v44  ;;  %v655_v18 = vpop.permute.xlu0 %654 }
 0x1a8   : > { %v522_v21 = vpop.permute.xlu1 %521  ;;  %v515_v61 = vmul.f32 %v1307_v28, %v509_v43  ;;  %v516_v25 = vmul.f32 %v1307_v28, %v510_v45 }
 0x1a9   : > { %v524_v29 = vsel %vm523_vm7, %v520_v16, %v522_v21  ;;  %v525_v31 = vsel %vm523_vm7, %v522_v21, %v520_v16 }
 0x1aa   : > { %v534_v51 = vmul.f32 %v529_v5, %v525_v31  ;;  %v535_v55 = vmul.f32 %v533_v8, %v524_v29  ;;  %v517_v9 = vadd.f32 %v515_v61, %v492_v3  ;;  %v518_v10 = vadd.f32 %v516_v25, %v493_v34 }
 0x1ac   : > { %v626_v56 = vpop.permute.xlu1 %625  ;;  %v540_v63 = vmul.f32 %v1305_v27, %v534_v51  ;;  %v541_v0 = vmul.f32 %v1305_v27, %v535_v55 }
 0x1ad   : > { %v628_v46 = vsel %vm627_vm8, %v1315_v35, %v626_v56  ;;  %v629_v26 = vsel %vm627_vm8, %v626_v56, %v1315_v35 }
 0x1ae   : > { %v638_v24 = vmul.f32 %v863_v33, %v628_v46  ;;  %v639_v58 = vmul.f32 %v864_v47, %v629_v26  ;;  %v548_v27 = vadd.f32 %v1327_v52, %v540_v63  ;;  %v549_v11 = vadd.f32 %v1329_v53, %v541_v0  ;;  %v345_v52 = vld [vmem:[%s1437_s5] sm:$0xf] }
 0x1b0   : > { %v644_v1 = vmul.f32 %v1309_v30, %v638_v24  ;;  %v645_v35 = vmul.f32 %v1309_v30, %v639_v58  ;;  %v553_v2 = vpop.permute.xlu1 %552 }
 0x1b1   : > { %v555_v4 = vsel %vm554_vm9, %v551_v62, %v553_v2  ;;  %v556_v5 = vsel %vm554_vm9, %v553_v2, %v551_v62 }
 0x1b2   : > { %v646_v6 = vadd.f32 %v644_v1, %v621_v59  ;;  %v647_v28 = vadd.f32 %v645_v35, %v622_v60  ;;  %v565_v7 = vmul.f32 %v560_v38, %v555_v4  ;;  %v566_v8 = vmul.f32 %v564_v39, %v556_v5 }
 0x1b4   : > { %v571_v30 = vmul.f32 %v1311_v32, %v565_v7  ;;  %v572_v12 = vmul.f32 %v1311_v32, %v566_v8  ;;  %v649_v41 = vadd.f32 %v647_v28, %v518_v10  ;;  %v648_v15 = vadd.f32 %v646_v6, %v517_v9  ;;  %v337_v32 = vld [vmem:[%s1270_s25] sm:$0xff] }
 0x1b5   : > { %v340_v53 = vcombine.high %v337_v32, %v337_v32  ;;  %342 = vst [vmem:[%s336_s14] sm:$0xf] %v337_v32 }
 0x1b6   : > { %v573_v13 = vadd.f32 %v571_v30, %v548_v27  ;;  %v574_v14 = vadd.f32 %v572_v12, %v549_v11 }
 0x1b7   : > { %343 = vst [vmem:[%s336_s14 + $0x8] sm:$0xf] %v340_v53 }
 0x1b8   : > { %v651_v16 = vadd.f32 %v649_v41, %v574_v14  ;;  %v650_v17 = vadd.f32 %v648_v15, %v573_v13 }
 0x1ba   : > { %v658_v19 = vadd.f32 %v655_v18, %v651_v16  ;;  %v657_v20 = vadd.f32 %v655_v18, %v650_v17 }
 0x1bc   : > { %865 = vmatprep.subr.msk.mxu1 %vm365_vm0, %v658_v19 }
 0x1bd   : > { %866 = vmatpush1.msk.msra.mxu1 %vm365_vm0, %v657_v20  ;;  %v662_v21 = vpop.permute.xlu1 %661 }
 0x1be   : > { %867 = vmatmul.mubr.msk.f32.vlgmr.msra.gmra.mxu1 %vm361_vm1, %v345_v52 }
 0x27e   : > { %v739_v22 = vpop.f32.mrf.mxu1 }
 0x27f   : > { %v740_v23 = vadd.f32 %v739_v22, %v662_v21 }
 0x280   : > { %v741_v29 = vpop.f32.mrf.mxu1 }
 0x281   : > { %v744_v31 = vmax.f32 %v740_v23, 0.0  ;;  %v742_v36 = vadd.f32 %v741_v29, %v662_v21 }
 0x283   : > { %v748_v37 = vrot.slane %v744_v31, 4  ;;  %v745_v38 = vmax.f32 %v742_v36, 0.0 }
 0x285   : > { %752 = vst [vmem:[%s336_s14] sm:$0xf0] %v748_v37  ;;  %v749_v39 = vrot.slane %v745_v38, 4 }
 0x287   : > { %753 = vst [vmem:[%s336_s14 + $0x8] sm:$0xf0] %v749_v39 }
 0x288   : > { %1032 = shalt.err (!%p1029_p0)
}
 0x289   : > { %s1033_s11 = scalar_lea.hbm %s767_s17, 256  ;;  %s1037_s19 = scalar_lea.hbm %s1440_s8, 512 }
 0x28a   : > { %p1034_p5 = scmp.ne.s32.totalorder %s767_s17, %s1033_s11  ;;  %p1038_p1 = scmp.lt.s32.totalorder %s767_s17, %s1440_s8 }
 0x28b   : > { %p1039_p4 = scmp.lt.s32.totalorder %s1037_s19, %s1033_s11 }
 0x28c   : > { %p1035_p9 = pnand %p1034_p5, %p1462_p3 }
 0x28d   : > { %p1040_p6 = por %p1039_p4, %p1038_p1 }
 0x28e   : > { %p1036_p12 = pneg %p1035_p9 }
 0x290   : > { %p1041_p8 = pnand %p1040_p6, %p1036_p12 }
 0x292   : > { %1044 = shalt.err (!%p1041_p8)
}
 0x293   : > { %881 = dma.vmem_to_hbm [thread:$0]  (%p1462_p3), %s770_s20, 256, %s767_s17, %s755_s10  }
 0x294 PF: > { %s781_s14 = sand.u32 1, %s1075_s27   ;;  %p1463_p11 = scmp.ne.s32.totalorder %s1449_s12, 0 }
 0x295   : > { %p1464_p7 = scmp.ge.s32.totalorder %s1087_s30, 2  ;;  %s782_s16 = scalar_lea.sflag [#allocation4], %s781_s14 }
 0x297   : > { %p892_p10 = pnand %p1464_p7, %p1463_p11 }
 0x299   : > { %p893_p2 = pneg %p892_p10 }
 0x29b   : > { %1070 = dma.done.wait (%p893_p2), %s782_s16, 256  }
 0x29c   : > { %1072 = vsyncadd (%p893_p2), %s782_s16, 4294967040  ;;  %s1465_s30 = sld [smem:[#allocation11_spill]]  ;;  %s1467_s27 = smov %s1079_s28 }
 0x29d   : > { %s1466_s25 = sld [smem:[#allocation12_spill]]  ;;  %s1468_s28 = smov %s1083_s29 }
 0x2a2   : > { %p22_p13 = scmp.ge.s32.totalorder %s1465_s30, 4  }
 0x2a3   : > { %s1469_s29 = smov %s1466_s25 }
 0x2a4   :  { %24 = sbr.rel (!%p22_p13) target bundleno = 8 (0x8), region = 101 }
 0x2a9   :  { %787 = vsyncpa [#allocation3], 1 }
 0x2aa   :  { %789 = vsyncpa [#allocation3 + $0x1], 1 }
 0x2ab   :  { %790 = vsyncpa [#allocation6], 1 }
 0x2ac   :  { %791 = vsyncpa [#allocation4], 1 }
 0x2ad   :  { %793 = vsyncpa [#allocation4 + $0x1], 1 }

</bundles_post_ra>
